<compile_context>
chip_gen: v6e
topology: v6e:2x2x1
jax: 0.10.0
libtpu: 0.0.40
codegen_flags: <defaults>
</compile_context>

<pallas_src>
import jax
import jax.numpy as jnp
from jax.experimental import pallas as pl
from jax.experimental.pallas import tpu as pltpu


def _make_mixconv_kernel(H, W):
    """Kernel closure over the static spatial shape (needed for roll/masks)."""
    HW = H * W

    def kernel(x_ref, w_ref, b_ref, o_ref):
        # x_ref: (1, C, HW)    input image, channels on sublanes, H*W on lanes
        # w_ref: (C2, 9*C)     combined (1x1 + 3x3) weights, BN scale folded in
        # b_ref: (C2, 1)       folded BN bias
        # o_ref: (1, C2, HW)
        x = x_ref[0]                                        # (C, HW) f32

        # flat spatial index -> column index (for the 3x3 edge masks)
        hw = jax.lax.broadcasted_iota(jnp.int32, (1, HW), 1)
        if (W & (W - 1)) == 0:                              # W power of two
            w_col = jnp.bitwise_and(hw, W - 1)
        else:
            w_col = jax.lax.rem(hw, W)

        # Build the 9 shifted taps of the 3x3 window via lane rolls (XLU) with
        # zero-masking at the image border (equivalent to padding=1).
        taps = []
        for dh in (-1, 0, 1):
            for dw in (-1, 0, 1):
                s = dh * W + dw                             # flat shift
                t = x if s == 0 else pltpu.roll(x, (-s) % HW, axis=1)
                conds = []
                if dh == -1:
                    conds.append(hw >= W)                   # not row 0
                if dh == 1:
                    conds.append(hw < (H - 1) * W)          # not last row
                if dw == -1:
                    conds.append(w_col >= 1)                # not col 0
                if dw == 1:
                    conds.append(w_col <= W - 2)            # not last col
                if conds:
                    valid = conds[0]
                    for c in conds[1:]:
                        valid = jnp.logical_and(valid, c)
                    t = jnp.where(valid, t, 0.0)
                taps.append(t)

        xs = jnp.concatenate(taps, axis=0)                  # (9*C, HW)

        # Single fused matmul: (C2, 9*C) @ (9*C, HW) -> (C2, HW), lane-dense.
        y = jax.lax.dot_general(
            w_ref[...], xs, (((1,), (0,)), ((), ())),
            preferred_element_type=jnp.float32)

        y = y + b_ref[...]                                  # folded BN bias
        y = jnp.where(y >= 0, y, 0.1 * y)                   # LeakyReLU(0.1)
        y = y + x.astype(jnp.float32)                       # residual (c2==c1)
        o_ref[0] = y.astype(o_ref.dtype)

    return kernel


def mixconv2d_nchw(x_nchw, w1, w3, bn_scale, bn_bias):
    """PyTorch-convention entry.

    x_nchw: (N, C, H, W) f32
    w1:     (co1, C)        1x1 conv weight (OI, bias=False)
    w3:     (co3, C, 3, 3)  3x3 conv weight (OIHW, bias=False)
    bn_scale/bn_bias: (C2,) folded eval-mode BatchNorm scale/bias
    returns (N, C2, H, W)
    """
    N, C, H, W = x_nchw.shape
    co1, co3 = w1.shape[0], w3.shape[0]
    C2 = co1 + co3
    assert C2 == C, "residual add in MixConv2d.forward requires c2 == c1"
    assert w1.shape[1] == C and w3.shape[1] == C
    HW = H * W

    # Free reshape (NCHW is contiguous): spatial flattened onto the lane axis.
    x_flat = x_nchw.reshape(N, C, HW)

    # Combined 9-tap weight (C2, 9*C); tap index t = kh*3 + kw, rows ordered
    # [1x1 outputs ; 3x3 outputs] to match torch.cat channel order.
    w3_flat = jnp.transpose(w3, (0, 2, 3, 1)).reshape(co3, 9 * C)
    wc = jnp.zeros((C2, 9 * C), x_nchw.dtype)
    wc = wc.at[:co1, 4 * C:5 * C].set(w1)       # 1x1 -> center tap only
    wc = wc.at[co1:, :].set(w3_flat)            # 3x3 -> all 9 taps
    wc = wc * bn_scale[:, None]                 # fold BN scale into weights
    bias = bn_bias.reshape(C2, 1).astype(jnp.float32)

    kernel = _make_mixconv_kernel(H, W)

    itemsize = 4
    flops = 2 * N * HW * C2 * 9 * C
    bytes_accessed = (x_flat.size + N * C2 * HW + wc.size + bias.size) * itemsize

    out_flat = pl.pallas_call(
        kernel,
        out_shape=jax.ShapeDtypeStruct((N, C2, HW), x_nchw.dtype),
        grid_spec=pltpu.PrefetchScalarGridSpec(
            num_scalar_prefetch=0,
            grid=(N,),
            in_specs=[
                pl.BlockSpec((1, C, HW), lambda n: (n, 0, 0)),
                pl.BlockSpec((C2, 9 * C), lambda n: (0, 0)),
                pl.BlockSpec((C2, 1), lambda n: (0, 0)),
            ],
            out_specs=pl.BlockSpec((1, C2, HW), lambda n: (n, 0, 0)),
        ),
        compiler_params=pltpu.CompilerParams(
            dimension_semantics=("parallel",)),
        cost_estimate=pl.CostEstimate(
            flops=flops, transcendentals=0, bytes_accessed=bytes_accessed),
    )(x_flat, wc, bias)

    return out_flat.reshape(N, C2, H, W)


def _reference_nchw(x, w1, w3, scale, bias):
    """Pure-JAX reference matching the PyTorch forward (eval-mode BN)."""
    dnums = ('NCHW', 'OIHW', 'NCHW')
    y1 = jax.lax.conv_general_dilated(
        x, w1[:, :, None, None], (1, 1), [(0, 0), (0, 0)],
        dimension_numbers=dnums, precision=jax.lax.Precision.HIGHEST)
    y3 = jax.lax.conv_general_dilated(
        x, w3, (1, 1), [(1, 1), (1, 1)],
        dimension_numbers=dnums, precision=jax.lax.Precision.HIGHEST)
    y = jnp.concatenate([y1, y3], axis=1)
    y = y * scale[None, :, None, None] + bias[None, :, None, None]
    y = jnp.where(y >= 0, y, 0.1 * y)
    return x + y


if __name__ == "__main__":
    # MixConv2d(c1=4, c2=4, k=(1,3), s=1, equal_ch=True) -> c_ = [2, 2]
    c1, c2 = 4, 4
    co1, co3 = 2, 2
    N, H, W = 2, 16, 16

    key = jax.random.PRNGKey(0)
    kx, kw1, kw3, kg, kb, km, kv = jax.random.split(key, 7)

    x = jax.random.normal(kx, (N, c1, H, W), jnp.float32)

    # conv weights (bias=False), PyTorch OIHW-style layouts
    w1 = 0.1 * jax.random.normal(kw1, (co1, c1), jnp.float32)
    w3 = 0.1 * jax.random.normal(kw3, (co3, c1, 3, 3), jnp.float32)

    # BatchNorm2d(c2) params / running stats, folded for eval mode
    gamma = 1.0 + 0.1 * jax.random.normal(kg, (c2,), jnp.float32)
    beta = 0.1 * jax.random.normal(kb, (c2,), jnp.float32)
    running_mean = 0.1 * jax.random.normal(km, (c2,), jnp.float32)
    running_var = 1.0 + 0.1 * jax.random.uniform(kv, (c2,), jnp.float32)
    eps = 1e-5
    bn_scale = gamma / jnp.sqrt(running_var + eps)
    bn_bias = beta - running_mean * bn_scale

    out = mixconv2d_nchw(x, w1, w3, bn_scale, bn_bias)
    out = jax.block_until_ready(out)

    ref = _reference_nchw(x, w1, w3, bn_scale, bn_bias)
    assert out.shape == (N, c2, H, W)
    err = float(jnp.max(jnp.abs(out - ref)))
    assert err < 2e-2, f"mismatch vs pure-JAX reference: {err}"

    print("KERNEL_OK")
</pallas_src>

<mosaic_0001>
module attributes {stable_mosaic.version = 11 : i64} {
  func.func @kernel(%arg0: i32, %arg1: memref<1x4x256xf32, #tpu.memory_space<vmem>>, %arg2: memref<4x36xf32, #tpu.memory_space<vmem>>, %arg3: memref<4x1xf32, #tpu.memory_space<vmem>>, %arg4: memref<1x4x256xf32, #tpu.memory_space<vmem>>) attributes {dimension_semantics = [#tpu.dimension_semantics<parallel>], iteration_bounds = array<i64: 2>, scalar_prefetch = 0 : i64, scratch_operands = 0 : i64, tpu.core_type = #tpu.core_type<tc>, window_params = [{transform_indices = @transform_0, window_bounds = array<i64: 1, 4, 256>}, {pipeline_mode = #tpu.pipeline_mode<synchronous>, transform_indices = @transform_1, window_bounds = array<i64: 4, 36>}, {pipeline_mode = #tpu.pipeline_mode<synchronous>, transform_indices = @transform_2, window_bounds = array<i64: 4, 1>}, {transform_indices = @transform_3, window_bounds = array<i64: 1, 4, 256>}]} {
    %c0 = arith.constant 0 : index
    %c0_0 = arith.constant 0 : index
    %c0_1 = arith.constant 0 : index
    %0 = vector.load %arg1[%c0, %c0_0, %c0_1] : memref<1x4x256xf32, #tpu.memory_space<vmem>>, vector<1x4x256xf32>
    %1 = vector.shape_cast %0 : vector<1x4x256xf32> to vector<4x256xf32>
    %2 = tpu.iota {dimensions = array<i32: 1>} : vector<1x256xi32>
    %c15_i32 = arith.constant 15 : i32
    %3 = vector.broadcast %c15_i32 : i32 to vector<1x256xi32>
    %4 = arith.andi %2, %3 : vector<1x256xi32>
    %c17_i32 = arith.constant 17 : i32
    %5 = tpu.dynamic_rotate %1 by %c17_i32 dim 1 : vector<4x256xf32>, i32 -> vector<4x256xf32>
    %c16_i32 = arith.constant 16 : i32
    %6 = vector.broadcast %c16_i32 : i32 to vector<1x256xi32>
    %7 = arith.cmpi sge, %2, %6 : vector<1x256xi32>
    %c1_i32 = arith.constant 1 : i32
    %8 = vector.broadcast %c1_i32 : i32 to vector<1x256xi32>
    %9 = arith.cmpi sge, %4, %8 : vector<1x256xi32>
    %10 = arith.andi %7, %9 : vector<1x256xi1>
    %cst = arith.constant 0.000000e+00 : f32
    %11 = vector.shape_cast %10 : vector<1x256xi1> to vector<1x256xi1>
    %12 = vector.broadcast %11 : vector<1x256xi1> to vector<4x256xi1>
    %13 = vector.broadcast %cst : f32 to vector<4x256xf32>
    %14 = arith.select %12, %5, %13 : vector<4x256xi1>, vector<4x256xf32>
    %c16_i32_2 = arith.constant 16 : i32
    %15 = tpu.dynamic_rotate %1 by %c16_i32_2 dim 1 : vector<4x256xf32>, i32 -> vector<4x256xf32>
    %c16_i32_3 = arith.constant 16 : i32
    %16 = vector.broadcast %c16_i32_3 : i32 to vector<1x256xi32>
    %17 = arith.cmpi sge, %2, %16 : vector<1x256xi32>
    %cst_4 = arith.constant 0.000000e+00 : f32
    %18 = vector.shape_cast %17 : vector<1x256xi1> to vector<1x256xi1>
    %19 = vector.broadcast %18 : vector<1x256xi1> to vector<4x256xi1>
    %20 = vector.broadcast %cst_4 : f32 to vector<4x256xf32>
    %21 = arith.select %19, %15, %20 : vector<4x256xi1>, vector<4x256xf32>
    %c15_i32_5 = arith.constant 15 : i32
    %22 = tpu.dynamic_rotate %1 by %c15_i32_5 dim 1 : vector<4x256xf32>, i32 -> vector<4x256xf32>
    %c16_i32_6 = arith.constant 16 : i32
    %23 = vector.broadcast %c16_i32_6 : i32 to vector<1x256xi32>
    %24 = arith.cmpi sge, %2, %23 : vector<1x256xi32>
    %c14_i32 = arith.constant 14 : i32
    %25 = vector.broadcast %c14_i32 : i32 to vector<1x256xi32>
    %26 = arith.cmpi sle, %4, %25 : vector<1x256xi32>
    %27 = arith.andi %24, %26 : vector<1x256xi1>
    %cst_7 = arith.constant 0.000000e+00 : f32
    %28 = vector.shape_cast %27 : vector<1x256xi1> to vector<1x256xi1>
    %29 = vector.broadcast %28 : vector<1x256xi1> to vector<4x256xi1>
    %30 = vector.broadcast %cst_7 : f32 to vector<4x256xf32>
    %31 = arith.select %29, %22, %30 : vector<4x256xi1>, vector<4x256xf32>
    %c1_i32_8 = arith.constant 1 : i32
    %32 = tpu.dynamic_rotate %1 by %c1_i32_8 dim 1 : vector<4x256xf32>, i32 -> vector<4x256xf32>
    %c1_i32_9 = arith.constant 1 : i32
    %33 = vector.broadcast %c1_i32_9 : i32 to vector<1x256xi32>
    %34 = arith.cmpi sge, %4, %33 : vector<1x256xi32>
    %cst_10 = arith.constant 0.000000e+00 : f32
    %35 = vector.shape_cast %34 : vector<1x256xi1> to vector<1x256xi1>
    %36 = vector.broadcast %35 : vector<1x256xi1> to vector<4x256xi1>
    %37 = vector.broadcast %cst_10 : f32 to vector<4x256xf32>
    %38 = arith.select %36, %32, %37 : vector<4x256xi1>, vector<4x256xf32>
    %c255_i32 = arith.constant 255 : i32
    %39 = tpu.dynamic_rotate %1 by %c255_i32 dim 1 : vector<4x256xf32>, i32 -> vector<4x256xf32>
    %c14_i32_11 = arith.constant 14 : i32
    %40 = vector.broadcast %c14_i32_11 : i32 to vector<1x256xi32>
    %41 = arith.cmpi sle, %4, %40 : vector<1x256xi32>
    %cst_12 = arith.constant 0.000000e+00 : f32
    %42 = vector.shape_cast %41 : vector<1x256xi1> to vector<1x256xi1>
    %43 = vector.broadcast %42 : vector<1x256xi1> to vector<4x256xi1>
    %44 = vector.broadcast %cst_12 : f32 to vector<4x256xf32>
    %45 = arith.select %43, %39, %44 : vector<4x256xi1>, vector<4x256xf32>
    %c241_i32 = arith.constant 241 : i32
    %46 = tpu.dynamic_rotate %1 by %c241_i32 dim 1 : vector<4x256xf32>, i32 -> vector<4x256xf32>
    %c240_i32 = arith.constant 240 : i32
    %47 = vector.broadcast %c240_i32 : i32 to vector<1x256xi32>
    %48 = arith.cmpi slt, %2, %47 : vector<1x256xi32>
    %c1_i32_13 = arith.constant 1 : i32
    %49 = vector.broadcast %c1_i32_13 : i32 to vector<1x256xi32>
    %50 = arith.cmpi sge, %4, %49 : vector<1x256xi32>
    %51 = arith.andi %48, %50 : vector<1x256xi1>
    %cst_14 = arith.constant 0.000000e+00 : f32
    %52 = vector.shape_cast %51 : vector<1x256xi1> to vector<1x256xi1>
    %53 = vector.broadcast %52 : vector<1x256xi1> to vector<4x256xi1>
    %54 = vector.broadcast %cst_14 : f32 to vector<4x256xf32>
    %55 = arith.select %53, %46, %54 : vector<4x256xi1>, vector<4x256xf32>
    %c240_i32_15 = arith.constant 240 : i32
    %56 = tpu.dynamic_rotate %1 by %c240_i32_15 dim 1 : vector<4x256xf32>, i32 -> vector<4x256xf32>
    %c240_i32_16 = arith.constant 240 : i32
    %57 = vector.broadcast %c240_i32_16 : i32 to vector<1x256xi32>
    %58 = arith.cmpi slt, %2, %57 : vector<1x256xi32>
    %cst_17 = arith.constant 0.000000e+00 : f32
    %59 = vector.shape_cast %58 : vector<1x256xi1> to vector<1x256xi1>
    %60 = vector.broadcast %59 : vector<1x256xi1> to vector<4x256xi1>
    %61 = vector.broadcast %cst_17 : f32 to vector<4x256xf32>
    %62 = arith.select %60, %56, %61 : vector<4x256xi1>, vector<4x256xf32>
    %c239_i32 = arith.constant 239 : i32
    %63 = tpu.dynamic_rotate %1 by %c239_i32 dim 1 : vector<4x256xf32>, i32 -> vector<4x256xf32>
    %c240_i32_18 = arith.constant 240 : i32
    %64 = vector.broadcast %c240_i32_18 : i32 to vector<1x256xi32>
    %65 = arith.cmpi slt, %2, %64 : vector<1x256xi32>
    %c14_i32_19 = arith.constant 14 : i32
    %66 = vector.broadcast %c14_i32_19 : i32 to vector<1x256xi32>
    %67 = arith.cmpi sle, %4, %66 : vector<1x256xi32>
    %68 = arith.andi %65, %67 : vector<1x256xi1>
    %cst_20 = arith.constant 0.000000e+00 : f32
    %69 = vector.shape_cast %68 : vector<1x256xi1> to vector<1x256xi1>
    %70 = vector.broadcast %69 : vector<1x256xi1> to vector<4x256xi1>
    %71 = vector.broadcast %cst_20 : f32 to vector<4x256xf32>
    %72 = arith.select %70, %63, %71 : vector<4x256xi1>, vector<4x256xf32>
    %73 = tpu.concatenate %14, %21, %31, %38, %1, %45, %55, %62, %72 in 0 : vector<4x256xf32>, vector<4x256xf32>, vector<4x256xf32>, vector<4x256xf32>, vector<4x256xf32>, vector<4x256xf32>, vector<4x256xf32>, vector<4x256xf32>, vector<4x256xf32> -> vector<36x256xf32>
    %c0_21 = arith.constant 0 : index
    %c0_22 = arith.constant 0 : index
    %74 = vector.load %arg2[%c0_21, %c0_22] : memref<4x36xf32, #tpu.memory_space<vmem>>, vector<4x36xf32>
    %cst_23 = arith.constant dense<0.000000e+00> : vector<4x256xf32>
    %75 = tpu.matmul %74, %73, %cst_23 {dimension_numbers = #tpu.dot_dimension_numbers<[1], [0], [0], [1], [0, 0, 1, 1], [], []>} : vector<4x36xf32>, vector<36x256xf32>, vector<4x256xf32> -> vector<4x256xf32>
    %c0_24 = arith.constant 0 : index
    %c0_25 = arith.constant 0 : index
    %76 = vector.load %arg3[%c0_24, %c0_25] : memref<4x1xf32, #tpu.memory_space<vmem>>, vector<4x1xf32>
    %77 = vector.broadcast %76 : vector<4x1xf32> to vector<4x256xf32>
    %78 = arith.addf %75, %77 : vector<4x256xf32>
    %cst_26 = arith.constant 0.000000e+00 : f32
    %79 = vector.broadcast %cst_26 : f32 to vector<4x256xf32>
    %80 = arith.cmpf oge, %78, %79 : vector<4x256xf32>
    %cst_27 = arith.constant 1.000000e-01 : f32
    %81 = vector.broadcast %cst_27 : f32 to vector<4x256xf32>
    %82 = arith.mulf %81, %78 : vector<4x256xf32>
    %83 = arith.select %80, %78, %82 : vector<4x256xi1>, vector<4x256xf32>
    %84 = arith.addf %83, %1 : vector<4x256xf32>
    %c0_28 = arith.constant 0 : index
    %c0_29 = arith.constant 0 : index
    %c0_30 = arith.constant 0 : index
    %85 = vector.load %arg4[%c0_28, %c0_29, %c0_30] : memref<1x4x256xf32, #tpu.memory_space<vmem>>, vector<1x4x256xf32>
    %86 = vector.shape_cast %85 : vector<1x4x256xf32> to vector<4x256xf32>
    %87 = vector.shape_cast %84 : vector<4x256xf32> to vector<1x4x256xf32>
    tpu.vector_store %arg4[%c0_28, %c0_29, %c0_30], %87 {strides = array<i32>} : memref<1x4x256xf32, #tpu.memory_space<vmem>>, vector<1x4x256xf32>,
    return
  }
  func.func @transform_0(%arg0: i32) -> (i32, i32, i32) {
    %c0_i32 = arith.constant 0 : i32
    %c0_i32_0 = arith.constant 0 : i32
    %c0_i32_1 = arith.constant 0 : i32
    return %arg0, %c0_i32, %c0_i32_0 : i32, i32, i32
  }
  func.func @transform_1(%arg0: i32) -> (i32, i32) {
    %c0_i32 = arith.constant 0 : i32
    %c0_i32_0 = arith.constant 0 : i32
    %c0_i32_1 = arith.constant 0 : i32
    return %c0_i32, %c0_i32_0 : i32, i32
  }
  func.func @transform_2(%arg0: i32) -> (i32, i32) {
    %c0_i32 = arith.constant 0 : i32
    %c0_i32_0 = arith.constant 0 : i32
    %c0_i32_1 = arith.constant 0 : i32
    return %c0_i32, %c0_i32_0 : i32, i32
  }
  func.func @transform_3(%arg0: i32) -> (i32, i32, i32) {
    %c0_i32 = arith.constant 0 : i32
    %c0_i32_0 = arith.constant 0 : i32
    %c0_i32_1 = arith.constant 0 : i32
    return %arg0, %c0_i32, %c0_i32_0 : i32, i32, i32
  }
}

</mosaic_0001>

<bundles_post_ra>
// kernel: tpu_custom_call.1
= control target key start
LH: loop header
LB: loop body
LE: loop exit
PB: predicated region body
PF: predicated region fallthrough
CT: control target
= control target key end

     0   :  { %8 = vsyncpa [#allocation3], 0  ;;  %s987_s0 = inlined_call_operand.hbm [shape: f32[2,4,256], index: 0, kind: input, shape index: {}]   ;;  %s988_s1 = inlined_call_operand.vmem [shape: f32[4,36], index: 1, kind: input, shape index: {}]   ;;  %s989_s2 = inlined_call_operand.vmem [shape: f32[4,1], index: 2, kind: input, shape index: {}]   ;;  %s990_s3 = inlined_call_operand.hbm [shape: f32[2,4,256], index: 3, kind: output, shape index: {}]  }
   0x1   :  { %10 = vsyncpa [#allocation3 + $0x1], 0 }
   0x2   :  { %11 = vsyncpa [#allocation4], 0 }
   0x3   :  { %13 = vsyncpa [#allocation4 + $0x1], 0  ;;  %s738_s12 = smov 0   ;;  %s740_s13 = smov 0  }
   0x4   :  { %s742_s14 = smov 0   ;;  %s744_s15 = smov 0  }
   0x5 LB: > { %s759_s16 = sadd.s32 4294967295, %s704_s15   ;;  %s535_s17 = sadd.s32 4294967294, %s704_s15   ;;  %s704_s15 = sphi %s744_s15, %s1015_s15   ;;  %s700_s14 = sphi %s742_s14, %s1014_s14   ;;  %s696_s13 = sphi %s740_s13, %s1013_s13   ;;  %s692_s12 = sphi %s738_s12, %s1012_s12  }
   0x6   : > { %s763_s18 = sadd.s32 1, %s704_s15   ;;  %s26_s19 = sadd.s32 1, %s700_s14 }
   0x7   : > { %s23_s20 = ssub.s32 %s704_s15, %s763_s18  ;;  %p33_p0 = scmp.ne.s32.totalorder %s700_s14, %s696_s13 }
   0x8   : > { %p24_p1 = scmp.eq.s32.totalorder %s23_s20, 0  ;;  %p34_p2 = scmp.eq.s32.totalorder %s704_s15, 0 }
   0x9   : > { %p39_p3 = scmp.ne.s32.totalorder %s696_s13, %s692_s12  ;;  %p40_p4 = scmp.eq.s32.totalorder %s759_s16, 0 }
   0xa   : > { %s775_s21 = scalar_select %p24_p1, %s700_s14, %s26_s19  }
   0xb   : > { %p777_p5 = por %p34_p2, %p33_p0  ;;  %p781_p6 = por %p40_p4, %p39_p3 }
   0xc   : > { %p105_p7 = scmp.eq.s32.totalorder %s759_s16, 1  ;;  %p111_p8 = scmp.eq.s32.totalorder %s535_s17, 1 }
   0xd   : > { %s994_s23 = scalar_select %p781_p6, 1, 0 }
   0xe   : > { %p566_p10 = scmp.lt.s32.totalorder %s704_s15, 2  ;;  %p788_p11 = por %p105_p7, %p33_p0 }
   0xf   : > { %p792_p12 = por %p111_p8, %p39_p3  ;;  %s137_s26 = sand.u32 1, %s700_s14  }
  0x10   : > { %s995_s24 = scalar_select %p788_p11, 1, 0 }
  0x11   : > { %s996_s25 = scalar_select %p792_p12, 1, 0 }
  0x12   : > { %s552_s27 = sshll.u32 %s704_s15, 7  ;;  %s538_s28 = sshll.u32 %s137_s26, 3 }
  0x13   : > { %s801_s4 = scalar_lea.hbm %s987_s0, %s552_s27  ;;  %s141_s5 = scalar_lea.vmem [#allocation2], %s538_s28 }
  0x14   : > { %s149_s6 = sshll.u32 %s141_s5, 4  ;;  %p805_p13 = pnand %p566_p10, %p777_p5  ;;  %s809_s6 = int_to_ptr.vmem [resolvable:$true] %s149_s6 }
  0x15   : > { %s138_s8 = scalar_lea.sflag [#allocation3], %s137_s26  ;;  %s612_s9 = scalar_lea.hbm %s801_s4, 128 }
  0x16   : > { %p613_p2 = scmp.ne.s32.totalorder %s801_s4, %s612_s9  ;;  %p614_p3 = pneg %p805_p13 }
  0x17   : > { %s617_s17 = scalar_lea.hbm %s987_s0, 256  ;;  %p618_p5 = scmp.lt.s32.totalorder %s801_s4, %s987_s0 }
  0x18   : > { %p615_p4 = pnand %p614_p3, %p613_p2  ;;  %p619_p8 = scmp.lt.s32.totalorder %s617_s17, %s612_s9 }
  0x1a   : > { %p616_p7 = pneg %p615_p4  ;;  %p620_p10 = por %p619_p8, %p618_p5 }
  0x1c   : > { %p621_p9 = pnand %p620_p10, %p616_p7 }
  0x1e   : > { %624 = shalt.err (!%p621_p9)
}
  0x1f   : > { %s625_s22 = scalar_lea.vmem %s809_s6, 128  ;;  %s706_s26 = smov [#allocation2]  }
  0x20   : > { %p626_p0 = scmp.ne.s32.totalorder %s809_s6, %s625_s22  ;;  %s630_s27 = sshll.u32 %s706_s26, 4  ;;  %s631_s27 = int_to_ptr.vmem [resolvable:$false] %s630_s27 }
  0x21   : > { %s632_s28 = scalar_lea.vmem %s631_s27, 256  ;;  %p633_p4 = scmp.lt.s32.totalorder %s809_s6, %s631_s27 }
  0x22   : > { %p628_p1 = pnand %p626_p0, %p614_p3  ;;  %p634_p12 = scmp.lt.s32.totalorder %s632_s28, %s625_s22 }
  0x24   : > { %p629_p2 = pneg %p628_p1  ;;  %p635_p11 = por %p634_p12, %p633_p4 }
  0x26   : > { %p636_p6 = pnand %p635_p11, %p629_p2 }
  0x28   : > { %639 = shalt.err (!%p636_p6)
}
  0x29   : > { %561 = dma.hbm_to_vmem [thread:$0]  (!%p805_p13), %s801_s4, 128, %s809_s6, %s138_s8  }
  0x2a   : > { %p998_p9 = scmp.lt.s32.totalorder %s704_s15, 3  ;;  %p999_p7 = scmp.ge.s32.totalorder %s704_s15, 1 }
  0x2c   : > { %p155_p0 = pnand %p999_p7, %p998_p9 }
  0x2d   : > { %s836_s29 = sand.u32 (!%p155_p0), 1, %s696_s13   ;;  %p1000_p6 = scmp.ne.s32.totalorder (!%p155_p0), %s994_s23, 0 }
  0x2e   : > { %158 = sbr.rel (%p155_p0) target bundleno = 418 (0x1a2), region = 32  ;;  %s542_s30 = sshll.u32 (!%p155_p0), %s836_s29, 3 }
  0x2f   : > { %s161_s5 = scalar_lea.sflag (!%p155_p0), [#allocation3], %s836_s29  ;;  %s164_s7 = scalar_lea.vmem (!%p155_p0), [#allocation2], %s542_s30 }
  0x33   : > { %683 = dma.done.wait (%p1000_p6), %s161_s5, 128  }
  0x34   : > { %685 = vsyncadd (%p1000_p6), %s161_s5, 4294967168  ;;  %v846_v0 = vld [vmem:[%s164_s7] sm:$0xff]  ;;  %s707_s4 = smov 111   ;;  %s708_s6 = smov 112   ;;  %v712_v2 = vmov 0.0   ;;  %v714_v3 = vmov 0   ;;  %v188_v5 = vlaneseq }
  0x35   : > { %301 = vrot.lane.b32.xlu1 %v846_v0, %s707_s4  ;;  %288 = vrot.lane.b32.xlu0 %v846_v0, %s708_s6  ;;  %v852_v1 = vcombine.high %v846_v0, %v846_v0  ;;  %s709_s8 = smov 127   ;;  %s710_s23 = smov 113   ;;  %v350_v4 = vld [vmem:[%s989_s2] sm:$0xf]  ;;  %vm340_vm5 = vcmask 1043456  }
  0x36   : > { %s711_s9 = smov 1   ;;  %430 = vmatprep.mubr.f32.mxu0 %v712_v2  ;;  %s713_s10 = smov 15   ;;  %610 = vset.pattern.permute.xlu0 %v714_v3  ;;  %v871_v6 = vand.u32 127, %v188_v5 }
  0x37   : > { %s715_s11 = smov 16   ;;  %s716_s17 = smov 17  }
  0x38   : > { %v190_v7 = vadd.s32 128, %v871_v6  ;;  %v191_v9 = vand.u32 15, %v871_v6  ;;  %vm305_vm2 = vcmp.lt.s32.totalorder %v871_v6, 111  ;;  %vm262_vm6 = vcmp.lt.s32.totalorder %v871_v6, 127  ;;  %s553_s27 = sshll.u32 %s759_s16, 7  ;;  %s186_s28 = scalar_lea.vmem [#allocation5], %s542_s30 }
  0x39   : > { %258 = vrot.lane.b32.xlu0 %v846_v0, %s709_s8  ;;  %303 = vrot.lane.b32.xlu1 %v852_v1, %s707_s4  ;;  %vm292_vm7 = vcmp.lt.s32.totalorder %v871_v6, 112  ;;  %vm275_vm9 = vcmp.lt.s32.totalorder %v871_v6, 113  ;;  %vm249_vm12 = vcmp.lt.s32.totalorder %v871_v6, 1  ;;  %vm203_vm13 = vcmp.ge.s32.totalorder %v871_v6, 16  ;;  %s465_s5 = sshll.u32 %s186_s28, 4  ;;  %p1009_p12 = scmp.ne.s32.totalorder %s995_s24, 0  ;;  %s466_s5 = int_to_ptr.vmem [resolvable:$true] %s465_s5 }
  0x3a   : > { %v192_v8 = vand.u32 15, %v190_v7  ;;  %vm279_vm1 = vcmp.lt.s32.totalorder %v190_v7, 240  ;;  %vm883_vm4 = vcmp.le.s32.totalorder %v191_v9, 14  ;;  %vm903_vm10 = vcmp.ge.s32.totalorder %v191_v9, 1  ;;  %s717_s16 = smov [#allocation5]  }
  0x3b   : > { %vm232_vm14 = vcmp.lt.s32.totalorder %v871_v6, 15  ;;  %vm237_vm15 = vmand %vm203_vm13, %vm883_vm4  ;;  %s644_s30 = sshll.u32 %s717_s16, 4  ;;  %s645_s30 = int_to_ptr.vmem [resolvable:$false] %s644_s30 }
  0x3c   : > { %vm875_vm0 = vcmp.le.s32.totalorder %v192_v8, 14  ;;  %vm893_vm8 = vcmp.ge.s32.totalorder %v192_v8, 1  ;;  %p647_p3 = scmp.lt.s32.totalorder %s466_s5, %s645_s30 }
  0x3d   : > { %260 = vrot.lane.b32.xlu1 %v852_v1, %s709_s8  ;;  %290 = vrot.lane.b32.xlu0 %v852_v1, %s708_s6  ;;  %vm309_vm3 = vmand %vm279_vm1, %vm875_vm0  ;;  %s463_s6 = scalar_lea.hbm %s990_s3, %s553_s27  ;;  %s451_s8 = scalar_lea.sflag [#allocation4], %s836_s29 }
  0x3e   : > { %vm281_vm11 = vmand %vm279_vm1, %vm893_vm8 }
  0x41   : > { %273 = vrot.lane.b32.xlu1 %v852_v1, %s710_s23  ;;  %271 = vrot.lane.b32.xlu0 %v846_v0, %s710_s23  ;;  %s640_s23 = scalar_lea.vmem %s466_s5, 128 }
  0x42   : > { %p641_p11 = scmp.ne.s32.totalorder %s466_s5, %s640_s23 }
  0x44   : > { %p642_p13 = pnand %p641_p11, %p1009_p12 }
  0x45   : > { %247 = vrot.lane.b32.xlu1 %v852_v1, %s711_s9  ;;  %245 = vrot.lane.b32.xlu0 %v846_v0, %s711_s9  ;;  %s646_s9 = scalar_lea.vmem %s645_s30, 256 }
  0x46   : > { %p643_p1 = pneg %p642_p13  ;;  %p648_p5 = scmp.lt.s32.totalorder %s646_s9, %s640_s23 }
  0x48   : > { %p649_p8 = por %p648_p5, %p647_p3 }
  0x49   : > { %230 = vrot.lane.b32.xlu1 %v852_v1, %s713_s10  ;;  %228 = vrot.lane.b32.xlu0 %v846_v0, %s713_s10 }
  0x4a   : > { %p650_p10 = pnand %p649_p8, %p643_p1 }
  0x4d   : > { %217 = vrot.lane.b32.xlu1 %v852_v1, %s715_s11  ;;  %215 = vrot.lane.b32.xlu0 %v846_v0, %s715_s11 }
  0x51   : > { %198 = vrot.lane.b32.xlu1 %v852_v1, %s716_s17  ;;  %196 = vrot.lane.b32.xlu0 %v846_v0, %s716_s17 }
  0x55   : > { %353 = vperm.xlu0 %610, %v350_v4  }
  0xa7   : > { %v302_v10 = vpop.permute.xlu1 %301  ;;  %v289_v11 = vpop.permute.xlu0 %288 }
  0xab   : > { %v259_v14 = vpop.permute.xlu0 %258  ;;  %v304_v15 = vpop.permute.xlu1 %303 }
  0xac   : > { %v306_v16 = vsel %vm305_vm2, %v302_v10, %v304_v15  ;;  %v307_v17 = vsel %vm305_vm2, %v304_v15, %v302_v10  ;;  %vm200_vm2 = vcmp.lt.s32.totalorder %v871_v6, 17  ;;  %v349_v15 = vld [vmem:[%s988_s1] sm:$0xf] }
  0xad   : > { %v315_v18 = vsel %vm309_vm3, %v307_v17, 0.0  ;;  %v314_v19 = vsel %vm883_vm4, %v306_v16, 0.0  ;;  %vm356_vm3 = vcmask 293888  }
  0xae   : > { %544 = vmatprep.subr.msk.mxu0 %vm340_vm5, %v315_v18 }
  0xaf   : > { %545 = vmatpush1.msk.msra.mxu0 %vm340_vm5, %v314_v19  ;;  %v261_v20 = vpop.permute.xlu1 %260  ;;  %v291_v21 = vpop.permute.xlu0 %290 }
  0xb0   : > { %v263_v23 = vsel %vm262_vm6, %v259_v14, %v261_v20  ;;  %v264_v24 = vsel %vm262_vm6, %v261_v20, %v259_v14  ;;  %v293_v25 = vsel %vm292_vm7, %v289_v11, %v291_v21  ;;  %v294_v26 = vsel %vm292_vm7, %v291_v21, %v289_v11 }
  0xb1   : > { %v270_v27 = vsel %vm875_vm0, %v264_v24, 0.0  ;;  %v300_v28 = vsel %vm279_vm1, %v294_v26, 0.0  ;;  %v269_v29 = vsel %vm883_vm4, %v263_v23, 0.0  ;;  %v336_v31 = vrot.slane %v293_v25, 4 }
  0xb2   : > { %v331_v34 = vrot.slane %v270_v27, 4  ;;  %v337_v35 = vrot.slane %v300_v28, 4  ;;  %v330_v38 = vrot.slane %v269_v29, 4  ;;  %vm219_vm1 = vcmp.lt.s32.totalorder %v871_v6, 16 }
  0xb3   : > { %v274_v32 = vpop.permute.xlu1 %273  ;;  %v272_v33 = vpop.permute.xlu0 %271 }
  0xb4   : > { %v276_v36 = vsel %vm275_vm9, %v272_v33, %v274_v32  ;;  %v277_v37 = vsel %vm275_vm9, %v274_v32, %v272_v33  ;;  %v346_v47 = vsel %vm340_vm5, %v852_v1, %v331_v34  ;;  %v345_v50 = vsel %vm340_vm5, %v846_v0, %v330_v38 }
  0xb5   : > { %v286_v39 = vsel %vm903_vm10, %v276_v36, 0.0  ;;  %v287_v40 = vsel %vm281_vm11, %v277_v37, 0.0 }
  0xb6   : > { %v348_v41 = vsel %vm340_vm5, %v287_v40, %v337_v35  ;;  %v347_v42 = vsel %vm340_vm5, %v286_v39, %v336_v31 }
  0xb7   : > { %v248_v43 = vpop.permute.xlu1 %247  ;;  %390 = vmatprep.subr.mxu0 %v348_v41  ;;  %v246_v44 = vpop.permute.xlu0 %245 }
  0xb8   : > { %v250_v45 = vsel %vm249_vm12, %v246_v44, %v248_v43  ;;  %v251_v46 = vsel %vm249_vm12, %v248_v43, %v246_v44  ;;  %391 = vmatpush1.msra.mxu0 %v347_v42 }
  0xb9   : > { %v256_v48 = vsel %vm903_vm10, %v251_v46, 0.0  ;;  %v257_v49 = vsel %vm893_vm8, %v250_v45, 0.0  ;;  %392 = vmatprep.subr.mxu0 %v346_v47 }
  0xba   : > { %393 = vmatpush1.msra.mxu0 %v345_v50  ;;  %v324_v53 = vrot.slane %v256_v48, 4  ;;  %v325_v54 = vrot.slane %v257_v49, 4 }
  0xbb   : > { %v231_v51 = vpop.permute.xlu1 %230  ;;  %v229_v52 = vpop.permute.xlu0 %228 }
  0xbc   : > { %v233_v55 = vsel %vm232_vm14, %v229_v52, %v231_v51  ;;  %v234_v56 = vsel %vm232_vm14, %v231_v51, %v229_v52 }
  0xbd   : > { %v243_v57 = vsel %vm237_vm15, %v234_v56, 0.0  ;;  %v244_v58 = vsel %vm875_vm0, %v233_v55, 0.0  ;;  %vm207_vm0 = vmand %vm203_vm13, %vm903_vm10 }
  0xbe   : > { %v344_v59 = vsel %vm340_vm5, %v244_v58, %v325_v54  ;;  %v343_v60 = vsel %vm340_vm5, %v243_v57, %v324_v53 }
  0xbf   : > { %v218_v61 = vpop.permute.xlu1 %217  ;;  %394 = vmatprep.subr.mxu0 %v344_v59  ;;  %v216_v62 = vpop.permute.xlu0 %215 }
  0xc0   : > { %v221_v63 = vsel %vm219_vm1, %v218_v61, %v216_v62  ;;  %395 = vmatpush1.msra.mxu0 %v343_v60  ;;  %v220_v2 = vsel %vm219_vm1, %v216_v62, %v218_v61 }
  0xc1   : > { %v226_v3 = vsel %vm203_vm13, %v221_v63, 0.0  ;;  %v319_v8 = vrot.slane %v220_v2, 4 }
  0xc2   : > { %v318_v7 = vrot.slane %v226_v3, 4 }
  0xc3   : > { %v199_v4 = vpop.permute.xlu1 %198  ;;  %v197_v5 = vpop.permute.xlu0 %196 }
  0xc4   : > { %v201_v9 = vsel %vm200_vm2, %v197_v5, %v199_v4  ;;  %v202_v10 = vsel %vm200_vm2, %v199_v4, %v197_v5 }
  0xc5   : > { %v213_v11 = vsel %vm207_vm0, %v202_v10, 0.0  ;;  %v214_v12 = vsel %vm893_vm8, %v201_v9, 0.0 }
  0xc6   : > { %v342_v13 = vsel %vm340_vm5, %v214_v12, %v319_v8  ;;  %v341_v14 = vsel %vm340_vm5, %v213_v11, %v318_v7 }
  0xc7   : > { %396 = vmatprep.subr.mxu0 %v342_v13 }
  0xc8   : > { %397 = vmatpush1.msra.mxu0 %v341_v14 }
  0xc9   : > { %546 = vmatmul.mubr.msk.f32.vlgmr.msra.gmra.mxu0 %vm356_vm3, %v349_v15 }
  0xd0   : > { %v354_v6 = vpop.permute.xlu0 %353 }
 0x189   : > { %v432_v16 = vpop.f32.mrf.mxu0 }
 0x18a   : > { %v433_v17 = vadd.f32 %v432_v16, %v354_v6 }
 0x18b   : > { %v434_v18 = vpop.f32.mrf.mxu0 }
 0x18c   : > { %vm437_vm4 = vcmp.ge.f32.partialorder %v433_v17, 0.0  ;;  %v439_v19 = vmul.f32 0.1, %v433_v17  ;;  %v435_v20 = vadd.f32 %v434_v18, %v354_v6 }
 0x18e   : > { %v441_v21 = vsel %vm437_vm4, %v433_v17, %v439_v19  ;;  %vm438_vm5 = vcmp.ge.f32.partialorder %v435_v20, 0.0  ;;  %v440_v22 = vmul.f32 0.1, %v435_v20 }
 0x18f   : > { %v443_v24 = vadd.f32 %v441_v21, %v846_v0 }
 0x190   : > { %v442_v23 = vsel %vm438_vm5, %v435_v20, %v440_v22 }
 0x191   : > { %v444_v25 = vadd.f32 %v442_v23, %v852_v1 }
 0x193   : > { %v447_v26 = vcombine.low %v443_v24, %v444_v25 }
 0x195   : > { %449 = vst [vmem:[%s186_s28] sm:$0xff] %v447_v26 }
 0x196   : > { %653 = shalt.err (!%p650_p10)
}
 0x197   : > { %s654_s10 = scalar_lea.hbm %s463_s6, 128  ;;  %s658_s17 = scalar_lea.hbm %s990_s3, 256 }
 0x198   : > { %p655_p2 = scmp.ne.s32.totalorder %s463_s6, %s654_s10  ;;  %p659_p7 = scmp.lt.s32.totalorder %s463_s6, %s990_s3 }
 0x199   : > { %p660_p0 = scmp.lt.s32.totalorder %s658_s17, %s654_s10 }
 0x19a   : > { %p656_p4 = pnand %p655_p2, %p1009_p12 }
 0x19b   : > { %p661_p6 = por %p660_p0, %p659_p7 }
 0x19c   : > { %p657_p9 = pneg %p656_p4 }
 0x19e   : > { %p662_p11 = pnand %p661_p6, %p657_p9 }
 0x1a0   : > { %665 = shalt.err (!%p662_p11)
}
 0x1a1   : > { %556 = dma.vmem_to_hbm [thread:$0]  (%p1009_p12), %s466_s5, 128, %s463_s6, %s451_s8  }
 0x1a2 PF: > { %s477_s22 = sand.u32 1, %s692_s12   ;;  %p1010_p13 = scmp.ne.s32.totalorder %s996_s25, 0 }
 0x1a3   : > { %p1011_p1 = scmp.ge.s32.totalorder %s704_s15, 2  ;;  %s478_s26 = scalar_lea.sflag [#allocation4], %s477_s22 }
 0x1a5   : > { %p563_p3 = pnand %p1011_p1, %p1010_p13 }
 0x1a7   : > { %p564_p5 = pneg %p563_p3 }
 0x1a9   : > { %687 = dma.done.wait (%p564_p5), %s478_s26, 128  }
 0x1aa   : > { %689 = vsyncadd (%p564_p5), %s478_s26, 4294967168  ;;  %p16_p8 = scmp.ge.s32.totalorder %s763_s18, 4   ;;  %s1012_s12 = smov %s696_s13 }
 0x1ab   : > { %s1013_s13 = smov %s700_s14  ;;  %s1014_s14 = smov %s775_s21 }
 0x1ac   : > { %s1015_s15 = smov %s763_s18  ;;  %18 = sbr.rel (!%p16_p8) target bundleno = 5 (0x5), region = 77 }
 0x1b1   :  { %483 = vsyncpa [#allocation3], 1 }
 0x1b2   :  { %485 = vsyncpa [#allocation3 + $0x1], 1 }
 0x1b3   :  { %486 = vsyncpa [#allocation4], 1 }
 0x1b4   :  { %488 = vsyncpa [#allocation4 + $0x1], 1 }

</bundles_post_ra>
